<compile_context>
chip_gen: v7x
topology: tpu7x:2x2x1
jax: 0.10.0
libtpu: 0.0.40
codegen_flags: <defaults>
</compile_context>

<pallas_src>
import functools

import jax
import jax.numpy as jnp
from jax.experimental import pallas as pl
from jax.experimental.pallas import tpu as pltpu


LANE = 128      # lane width for the padded final-layer output
TB_MAX = 1024   # max batch tile (amortizes per-grid-step overhead)


def _round_up(x, m):
    return -(-x // m) * m


def qnet_kernel(x_ref,
                w1_ref, b1_ref,
                w2_ref, b2_ref,
                w3_ref, b3_ref,
                w4_ref, b4_ref,
                o_ref):
    """Fused 4-layer MLP on one batch tile: 4 MXU matmuls + 3 ReLUs in VMEM."""
    x = x_ref[...]
    if x.dtype != jnp.bfloat16:           # accept bf16 inputs natively
        x = x.astype(jnp.bfloat16)

    h = jnp.dot(x, w1_ref[...], preferred_element_type=jnp.float32) + b1_ref[...]
    h = jnp.maximum(h.astype(jnp.bfloat16), 0.0)   # bf16 ReLU (VPU bf16 path)

    h = jnp.dot(h, w2_ref[...], preferred_element_type=jnp.float32) + b2_ref[...]
    h = jnp.maximum(h.astype(jnp.bfloat16), 0.0)

    h = jnp.dot(h, w3_ref[...], preferred_element_type=jnp.float32) + b3_ref[...]
    h = jnp.maximum(h.astype(jnp.bfloat16), 0.0)

    out = jnp.dot(h, w4_ref[...], preferred_element_type=jnp.float32) + b4_ref[...]
    # bf16 writeback halves the dominant output HBM stream; caller upcasts once.
    o_ref[...] = out.astype(o_ref.dtype)


def _resident_spec(shape):
    """Whole-array block, constant across the grid (weights/biases).

    Constant index_map -> one DMA per call; pl.Buffered(1) drops the unused
    second pipeline buffer (falls back gracefully on older jax)."""
    index_map = lambda i: tuple(0 for _ in shape)
    buffered = getattr(pl, "Buffered", None)
    if buffered is not None:
        try:
            return pl.BlockSpec(shape, index_map, pipeline_mode=buffered(1))
        except TypeError:
            pass
    return pl.BlockSpec(shape, index_map)


def _choose_tile(batch):
    """Pick the batch tile.

    Large enough to amortize the ~0.35 us per-grid-step overhead, chosen to
    waste < ~1 tile of batch padding, and split so grid >= 2 whenever the
    batch allows it (so both v7x TensorCores get work)."""
    padded8 = _round_up(batch, 8)
    cands = [t for t in (TB_MAX, 512, 256, 128) if t <= padded8] or [padded8]
    # minimize padding waste; prefer the larger tile on ties
    tb = min(cands, key=lambda t: (_round_up(batch, t) - batch, -t))
    padded_batch = _round_up(batch, tb)
    if padded_batch // tb < 2 and padded8 >= 16:
        tb = _round_up(-(-padded8 // 2), 8)
        padded_batch = _round_up(batch, tb)
    return tb, padded_batch


@functools.partial(jax.jit, static_argnames=("output_dim",))
def qnetwork_forward(x, params, *, output_dim):
    """x: (batch, input_dim) f32 or bf16.

    params: output of prepare_params() -- bf16 weights, f32 (1,d) biases,
    with w4/b4 already zero-padded to a multiple of 128 output columns."""
    w1, b1 = params["w1"], params["b1"]
    w2, b2 = params["w2"], params["b2"]
    w3, b3 = params["w3"], params["b3"]
    w4, b4 = params["w4"], params["b4"]

    batch, input_dim = x.shape
    out_pad = w4.shape[1]
    assert out_pad % LANE == 0 and out_pad >= output_dim

    tb, padded_batch = _choose_tile(batch)
    if padded_batch != batch:
        x = jnp.pad(x, ((0, padded_batch - batch), (0, 0)))

    grid = (padded_batch // tb,)

    x_spec = pl.BlockSpec((tb, input_dim), lambda i: (i, 0))
    out_spec = pl.BlockSpec((tb, out_pad), lambda i: (i, 0))

    args = (x, w1, b1, w2, b2, w3, b3, w4, b4)
    in_specs = [x_spec] + [_resident_spec(a.shape) for a in args[1:]]

    # VMEM at tb=1024: double-buffered x/out blocks + ~230 KB resident weights
    # + (tb,256) f32 temporaries stays well under the 16 MiB v5e scoped limit,
    # so no vmem_limit_bytes override is required.
    out = pl.pallas_call(
        qnet_kernel,
        grid=grid,
        in_specs=in_specs,
        out_specs=out_spec,
        out_shape=jax.ShapeDtypeStruct((padded_batch, out_pad), jnp.bfloat16),
        compiler_params=pltpu.CompilerParams(
            dimension_semantics=("parallel",)),
    )(*args)

    # Slice off lane/batch padding; single upcast of the bf16 writeback.
    return out[:batch, :output_dim].astype(jnp.float32)


def init_params(key, input_dim, output_dim):
    """Mimics torch.nn.Linear default init U(-1/sqrt(fan_in), +); weights bf16."""
    dims = [(input_dim, 256), (256, 256), (256, 128), (128, output_dim)]
    params = {}
    for idx, (fan_in, fan_out) in enumerate(dims, start=1):
        key, kw, kb = jax.random.split(key, 3)
        bound = 1.0 / jnp.sqrt(float(fan_in))
        w = jax.random.uniform(kw, (fan_in, fan_out), jnp.float32, -bound, bound)
        b = jax.random.uniform(kb, (1, fan_out), jnp.float32, -bound, bound)
        params[f"w{idx}"] = w.astype(jnp.bfloat16)
        params[f"b{idx}"] = b
    return params


def prepare_params(params):
    """One-time param prep (outside the jitted forward): zero-pad the final
    layer's columns to a multiple of 128 so kernel output stores are lane-dense."""
    params = dict(params)
    w4, b4 = params["w4"], params["b4"]
    out_dim = w4.shape[1]
    out_pad = _round_up(out_dim, LANE)
    if out_pad != out_dim:
        params["w4"] = jnp.pad(w4, ((0, 0), (0, out_pad - out_dim)))
        params["b4"] = jnp.pad(b4, ((0, 0), (0, out_pad - out_dim)))
    return params


def reference_forward(x, params):
    """Plain-JAX reference with the same bf16-weight / f32-accum arithmetic."""
    h = x
    for idx in range(1, 5):
        w = params[f"w{idx}"]
        b = params[f"b{idx}"]
        h = jnp.dot(h.astype(jnp.bfloat16), w,
                    preferred_element_type=jnp.float32) + b
        if idx < 4:
            h = jnp.maximum(h, 0.0)
    return h


if __name__ == "__main__":
    key = jax.random.PRNGKey(0)
    batch, input_dim, output_dim = 2, 32, 8

    key, kx = jax.random.split(key)
    x = jax.random.normal(kx, (batch, input_dim), jnp.float32)
    params = init_params(key, input_dim, output_dim)
    prepared = prepare_params(params)          # one-time lane-padding of w4/b4

    out = qnetwork_forward(x, prepared, output_dim=output_dim)
    jax.block_until_ready(out)

    ref = reference_forward(x, params)
    assert out.shape == (batch, output_dim), out.shape
    max_err = jnp.max(jnp.abs(out - ref))
    assert jnp.allclose(out, ref, atol=2e-2, rtol=2e-2), f"max abs err = {max_err}"

    print("KERNEL_OK")
</pallas_src>

<mosaic_0001>
module attributes {stable_mosaic.version = 11 : i64} {
  func.func @qnet_kernel(%arg0: i32, %arg1: memref<8x32xf32, #tpu.memory_space<vmem>>, %arg2: memref<32x256xbf16, #tpu.memory_space<vmem>>, %arg3: memref<1x256xf32, #tpu.memory_space<vmem>>, %arg4: memref<256x256xbf16, #tpu.memory_space<vmem>>, %arg5: memref<1x256xf32, #tpu.memory_space<vmem>>, %arg6: memref<256x128xbf16, #tpu.memory_space<vmem>>, %arg7: memref<1x128xf32, #tpu.memory_space<vmem>>, %arg8: memref<128x128xbf16, #tpu.memory_space<vmem>>, %arg9: memref<1x128xf32, #tpu.memory_space<vmem>>, %arg10: memref<8x128xbf16, #tpu.memory_space<vmem>>) attributes {dimension_semantics = [#tpu.dimension_semantics<parallel>], iteration_bounds = array<i64: 1>, scalar_prefetch = 0 : i64, scratch_operands = 0 : i64, tpu.core_type = #tpu.core_type<tc>, window_params = [{transform_indices = @transform_0, window_bounds = array<i64: 8, 32>}, {pipeline_mode = #tpu.pipeline_mode<synchronous>, transform_indices = @transform_1, window_bounds = array<i64: 32, 256>}, {pipeline_mode = #tpu.pipeline_mode<synchronous>, transform_indices = @transform_2, window_bounds = array<i64: 1, 256>}, {pipeline_mode = #tpu.pipeline_mode<synchronous>, transform_indices = @transform_3, window_bounds = array<i64: 256, 256>}, {pipeline_mode = #tpu.pipeline_mode<synchronous>, transform_indices = @transform_4, window_bounds = array<i64: 1, 256>}, {pipeline_mode = #tpu.pipeline_mode<synchronous>, transform_indices = @transform_5, window_bounds = array<i64: 256, 128>}, {pipeline_mode = #tpu.pipeline_mode<synchronous>, transform_indices = @transform_6, window_bounds = array<i64: 1, 128>}, {pipeline_mode = #tpu.pipeline_mode<synchronous>, transform_indices = @transform_7, window_bounds = array<i64: 128, 128>}, {pipeline_mode = #tpu.pipeline_mode<synchronous>, transform_indices = @transform_8, window_bounds = array<i64: 1, 128>}, {transform_indices = @transform_9, window_bounds = array<i64: 8, 128>}]} {
    %c0 = arith.constant 0 : index
    %c0_0 = arith.constant 0 : index
    %0 = vector.load %arg1[%c0, %c0_0] : memref<8x32xf32, #tpu.memory_space<vmem>>, vector<8x32xf32>
    %1 = arith.truncf %0 : vector<8x32xf32> to vector<8x32xbf16>
    %c0_1 = arith.constant 0 : index
    %c0_2 = arith.constant 0 : index
    %2 = vector.load %arg2[%c0_1, %c0_2] : memref<32x256xbf16, #tpu.memory_space<vmem>>, vector<32x256xbf16>
    %cst = arith.constant dense<0.000000e+00> : vector<8x256xf32>
    %3 = tpu.matmul %1, %2, %cst {dimension_numbers = #tpu.dot_dimension_numbers<[1], [0], [0], [1], [0, 0, 1, 1], [], []>} : vector<8x32xbf16>, vector<32x256xbf16>, vector<8x256xf32> -> vector<8x256xf32>
    %c0_3 = arith.constant 0 : index
    %c0_4 = arith.constant 0 : index
    %4 = vector.load %arg3[%c0_3, %c0_4] : memref<1x256xf32, #tpu.memory_space<vmem>>, vector<1x256xf32>
    %5 = vector.broadcast %4 : vector<1x256xf32> to vector<8x256xf32>
    %6 = arith.addf %3, %5 : vector<8x256xf32>
    %7 = arith.truncf %6 : vector<8x256xf32> to vector<8x256xbf16>
    %cst_5 = arith.constant 0.000000e+00 : bf16
    %8 = vector.broadcast %cst_5 : bf16 to vector<8x256xbf16>
    %9 = arith.maximumf %7, %8 : vector<8x256xbf16>
    %c0_6 = arith.constant 0 : index
    %c0_7 = arith.constant 0 : index
    %10 = vector.load %arg4[%c0_6, %c0_7] : memref<256x256xbf16, #tpu.memory_space<vmem>>, vector<256x256xbf16>
    %cst_8 = arith.constant dense<0.000000e+00> : vector<8x256xf32>
    %11 = tpu.matmul %9, %10, %cst_8 {dimension_numbers = #tpu.dot_dimension_numbers<[1], [0], [0], [1], [0, 0, 1, 1], [], []>} : vector<8x256xbf16>, vector<256x256xbf16>, vector<8x256xf32> -> vector<8x256xf32>
    %c0_9 = arith.constant 0 : index
    %c0_10 = arith.constant 0 : index
    %12 = vector.load %arg5[%c0_9, %c0_10] : memref<1x256xf32, #tpu.memory_space<vmem>>, vector<1x256xf32>
    %13 = vector.broadcast %12 : vector<1x256xf32> to vector<8x256xf32>
    %14 = arith.addf %11, %13 : vector<8x256xf32>
    %15 = arith.truncf %14 : vector<8x256xf32> to vector<8x256xbf16>
    %cst_11 = arith.constant 0.000000e+00 : bf16
    %16 = vector.broadcast %cst_11 : bf16 to vector<8x256xbf16>
    %17 = arith.maximumf %15, %16 : vector<8x256xbf16>
    %c0_12 = arith.constant 0 : index
    %c0_13 = arith.constant 0 : index
    %18 = vector.load %arg6[%c0_12, %c0_13] : memref<256x128xbf16, #tpu.memory_space<vmem>>, vector<256x128xbf16>
    %cst_14 = arith.constant dense<0.000000e+00> : vector<8x128xf32>
    %19 = tpu.matmul %17, %18, %cst_14 {dimension_numbers = #tpu.dot_dimension_numbers<[1], [0], [0], [1], [0, 0, 1, 1], [], []>} : vector<8x256xbf16>, vector<256x128xbf16>, vector<8x128xf32> -> vector<8x128xf32>
    %c0_15 = arith.constant 0 : index
    %c0_16 = arith.constant 0 : index
    %20 = vector.load %arg7[%c0_15, %c0_16] : memref<1x128xf32, #tpu.memory_space<vmem>>, vector<1x128xf32>
    %21 = vector.broadcast %20 : vector<1x128xf32> to vector<8x128xf32>
    %22 = arith.addf %19, %21 : vector<8x128xf32>
    %23 = arith.truncf %22 : vector<8x128xf32> to vector<8x128xbf16>
    %cst_17 = arith.constant 0.000000e+00 : bf16
    %24 = vector.broadcast %cst_17 : bf16 to vector<8x128xbf16>
    %25 = arith.maximumf %23, %24 : vector<8x128xbf16>
    %c0_18 = arith.constant 0 : index
    %c0_19 = arith.constant 0 : index
    %26 = vector.load %arg8[%c0_18, %c0_19] : memref<128x128xbf16, #tpu.memory_space<vmem>>, vector<128x128xbf16>
    %cst_20 = arith.constant dense<0.000000e+00> : vector<8x128xf32>
    %27 = tpu.matmul %25, %26, %cst_20 {dimension_numbers = #tpu.dot_dimension_numbers<[1], [0], [0], [1], [0, 0, 1, 1], [], []>} : vector<8x128xbf16>, vector<128x128xbf16>, vector<8x128xf32> -> vector<8x128xf32>
    %c0_21 = arith.constant 0 : index
    %c0_22 = arith.constant 0 : index
    %28 = vector.load %arg9[%c0_21, %c0_22] : memref<1x128xf32, #tpu.memory_space<vmem>>, vector<1x128xf32>
    %29 = vector.broadcast %28 : vector<1x128xf32> to vector<8x128xf32>
    %30 = arith.addf %27, %29 : vector<8x128xf32>
    %31 = arith.truncf %30 : vector<8x128xf32> to vector<8x128xbf16>
    %c0_23 = arith.constant 0 : index
    %c0_24 = arith.constant 0 : index
    %32 = vector.load %arg10[%c0_23, %c0_24] : memref<8x128xbf16, #tpu.memory_space<vmem>>, vector<8x128xbf16>
    tpu.vector_store %arg10[%c0_23, %c0_24], %31 {strides = array<i32>} : memref<8x128xbf16, #tpu.memory_space<vmem>>, vector<8x128xbf16>,
    return
  }
  func.func @transform_0(%arg0: i32) -> (i32, i32) {
    %c0_i32 = arith.constant 0 : i32
    %c0_i32_0 = arith.constant 0 : i32
    return %arg0, %c0_i32 : i32, i32
  }
  func.func @transform_1(%arg0: i32) -> (i32, i32) {
    %c0_i32 = arith.constant 0 : i32
    %c0_i32_0 = arith.constant 0 : i32
    %c0_i32_1 = arith.constant 0 : i32
    return %c0_i32, %c0_i32_0 : i32, i32
  }
  func.func @transform_2(%arg0: i32) -> (i32, i32) {
    %c0_i32 = arith.constant 0 : i32
    %c0_i32_0 = arith.constant 0 : i32
    %c0_i32_1 = arith.constant 0 : i32
    return %c0_i32, %c0_i32_0 : i32, i32
  }
  func.func @transform_3(%arg0: i32) -> (i32, i32) {
    %c0_i32 = arith.constant 0 : i32
    %c0_i32_0 = arith.constant 0 : i32
    %c0_i32_1 = arith.constant 0 : i32
    return %c0_i32, %c0_i32_0 : i32, i32
  }
  func.func @transform_4(%arg0: i32) -> (i32, i32) {
    %c0_i32 = arith.constant 0 : i32
    %c0_i32_0 = arith.constant 0 : i32
    %c0_i32_1 = arith.constant 0 : i32
    return %c0_i32, %c0_i32_0 : i32, i32
  }
  func.func @transform_5(%arg0: i32) -> (i32, i32) {
    %c0_i32 = arith.constant 0 : i32
    %c0_i32_0 = arith.constant 0 : i32
    %c0_i32_1 = arith.constant 0 : i32
    return %c0_i32, %c0_i32_0 : i32, i32
  }
  func.func @transform_6(%arg0: i32) -> (i32, i32) {
    %c0_i32 = arith.constant 0 : i32
    %c0_i32_0 = arith.constant 0 : i32
    %c0_i32_1 = arith.constant 0 : i32
    return %c0_i32, %c0_i32_0 : i32, i32
  }
  func.func @transform_7(%arg0: i32) -> (i32, i32) {
    %c0_i32 = arith.constant 0 : i32
    %c0_i32_0 = arith.constant 0 : i32
    %c0_i32_1 = arith.constant 0 : i32
    return %c0_i32, %c0_i32_0 : i32, i32
  }
  func.func @transform_8(%arg0: i32) -> (i32, i32) {
    %c0_i32 = arith.constant 0 : i32
    %c0_i32_0 = arith.constant 0 : i32
    %c0_i32_1 = arith.constant 0 : i32
    return %c0_i32, %c0_i32_0 : i32, i32
  }
  func.func @transform_9(%arg0: i32) -> (i32, i32) {
    %c0_i32 = arith.constant 0 : i32
    %c0_i32_0 = arith.constant 0 : i32
    return %arg0, %c0_i32 : i32, i32
  }
}

</mosaic_0001>

<bundles_post_ra>
// kernel: qnetwork_forward.1
= control target key start
LH: loop header
LB: loop body
LE: loop exit
PB: predicated region body
PF: predicated region fallthrough
CT: control target
= control target key end

     0   :  { %14 = vsyncpa [#allocation3], 0  ;;  %s1158_s0 = inlined_call_operand.vmem [shape: f32[8,32], index: 0, kind: input, shape index: {}]   ;;  %s1159_s1 = inlined_call_operand.hbm [shape: bf16[32,256], index: 1, kind: input, shape index: {}]   ;;  %s1160_s2 = inlined_call_operand.vmem [shape: f32[1,256], index: 2, kind: input, shape index: {}]   ;;  %s1161_s3 = inlined_call_operand.hbm [shape: bf16[256,256], index: 3, kind: input, shape index: {}]   ;;  %s1162_s4 = inlined_call_operand.vmem [shape: f32[1,256], index: 4, kind: input, shape index: {}]   ;;  %s1163_s5 = inlined_call_operand.hbm [shape: bf16[256,128], index: 5, kind: input, shape index: {}]   ;;  %s1164_s6 = inlined_call_operand.vmem [shape: f32[1,128], index: 6, kind: input, shape index: {}]   ;;  %s1165_s7 = inlined_call_operand.hbm [shape: bf16[128,128], index: 7, kind: input, shape index: {}]   ;;  %s1166_s8 = inlined_call_operand.vmem [shape: f32[1,128], index: 8, kind: input, shape index: {}]   ;;  %s1167_s9 = inlined_call_operand.vmem [shape: bf16[8,128], index: 9, kind: output, shape index: {}]  }
   0x1   :  { %15 = vsyncpa [#allocation5], 0 }
   0x2   :  { %16 = vsyncpa [#allocation8], 0  ;;  %s1018_s30 = smov [#allocation4]   ;;  %s1019_s11 = smov [#allocation2]  }
   0x3   :  { %s38_s10 = sshll.u32 %s1018_s30, 4  ;;  %s24_s12 = sshll.u32 %s1019_s11, 4  ;;  %s39_s10 = int_to_ptr.vmem [resolvable:$true] %s38_s10  ;;  %s1079_s12 = int_to_ptr.vmem [resolvable:$true] %s24_s12 }
   0x4   :  { %s924_s15 = scalar_lea.hbm %s1161_s3, 4096 }
   0x5   :  { %p925_p0 = scmp.ne.s32.totalorder %s1161_s3, %s924_s15  ;;  %p928_p1 = scmp.lt.u32.totalorder %s924_s15, %s1161_s3 }
   0x7   :  { %p930_p2 = pnand %p928_p1, %p925_p0 }
   0x9   :  { %933 = shalt.err (!%p930_p2)
}
   0xa   :  { %s934_s20 = scalar_lea.vmem %s39_s10, 4096  ;;  %p939_p4 = scmp.lt.s32.totalorder %s39_s10, %s39_s10 }
   0xb   :  { %p935_p3 = scmp.ne.s32.totalorder %s39_s10, %s934_s20  ;;  %p940_p5 = scmp.lt.s32.totalorder %s934_s20, %s934_s20 }
   0xd   :  { %p941_p6 = por %p940_p5, %p939_p4 }
   0xf   :  { %p942_p7 = pnand %p941_p6, %p935_p3 }
  0x11   :  { %945 = shalt.err (!%p942_p7)
}
  0x12   :  { %s1020_s21 = smov 128   ;;  %s1021_s22 = smov 8  }
  0x13   :  { %44 = dma.hbm_to_vmem [thread:$0]  %s1161_s3, 4096, %s39_s10, [#allocation5], %s1020_s21, %s1020_s21, %s1021_s22  }
  0x14   :  { %s946_s27 = scalar_lea.hbm %s1159_s1, 512 }
  0x15   :  { %p947_p8 = scmp.ne.s32.totalorder %s1159_s1, %s946_s27  ;;  %p950_p9 = scmp.lt.u32.totalorder %s946_s27, %s1159_s1 }
  0x17   :  { %p952_p10 = pnand %p950_p9, %p947_p8 }
  0x19   :  { %955 = shalt.err (!%p952_p10)
}
  0x1a   :  { %s956_s13 = scalar_lea.vmem %s1079_s12, 512  ;;  %p961_p12 = scmp.lt.s32.totalorder %s1079_s12, %s1079_s12 }
  0x1b   :  { %p957_p11 = scmp.ne.s32.totalorder %s1079_s12, %s956_s13  ;;  %p962_p13 = scmp.lt.s32.totalorder %s956_s13, %s956_s13 }
  0x1d   :  { %p963_p0 = por %p962_p13, %p961_p12 }
  0x1f   :  { %p964_p1 = pnand %p963_p0, %p957_p11 }
  0x21   :  { %967 = shalt.err (!%p964_p1)
}
  0x22   :  { %30 = dma.hbm_to_vmem [thread:$0]  %s1159_s1, 512, %s1079_s12, [#allocation3], %s1020_s21, %s1020_s21, %s1021_s22  }
  0x23   :  { %s1022_s14 = smov [#allocation6]   ;;  %s968_s18 = scalar_lea.hbm %s1163_s5, 2048 }
  0x24   :  { %s52_s15 = sshll.u32 %s1022_s14, 4  ;;  %p969_p2 = scmp.ne.s32.totalorder %s1163_s5, %s968_s18  ;;  %s53_s15 = int_to_ptr.vmem [resolvable:$true] %s52_s15 }
  0x25   :  { %p972_p3 = scmp.lt.u32.totalorder %s968_s18, %s1163_s5 }
  0x27   :  { %p974_p4 = pnand %p972_p3, %p969_p2 }
  0x29   :  { %977 = shalt.err (!%p974_p4)
}
  0x2a   :  { %s978_s25 = scalar_lea.vmem %s53_s15, 2048  ;;  %p983_p6 = scmp.lt.s32.totalorder %s53_s15, %s53_s15 }
  0x2b   :  { %p979_p5 = scmp.ne.s32.totalorder %s53_s15, %s978_s25  ;;  %p984_p7 = scmp.lt.s32.totalorder %s978_s25, %s978_s25 }
  0x2d   :  { %p985_p8 = por %p984_p7, %p983_p6 }
  0x2f   :  { %p986_p9 = pnand %p985_p8, %p979_p5 }
  0x31   :  { %989 = shalt.err (!%p986_p9)
}
  0x32   :  { %s1023_s1 = smov 64   ;;  %s1024_s12 = smov 4  }
  0x33   :  { %58 = dma.hbm_to_vmem [thread:$0]  %s1163_s5, 2048, %s53_s15, [#allocation5], %s1023_s1, %s1023_s1, %s1024_s12  }
  0x34   :  { %s1025_s26 = smov [#allocation7]   ;;  %s990_s30 = scalar_lea.hbm %s1165_s7, 1024 }
  0x35   :  { %s66_s27 = sshll.u32 %s1025_s26, 4  ;;  %p991_p10 = scmp.ne.s32.totalorder %s1165_s7, %s990_s30  ;;  %s67_s27 = int_to_ptr.vmem [resolvable:$true] %s66_s27 }
  0x36   :  { %p994_p11 = scmp.lt.u32.totalorder %s990_s30, %s1165_s7 }
  0x38   :  { %p996_p12 = pnand %p994_p11, %p991_p10 }
  0x3a   :  { %999 = shalt.err (!%p996_p12)
}
  0x3b   :  { %s1000_s14 = scalar_lea.vmem %s67_s27, 1024  ;;  %p1005_p0 = scmp.lt.s32.totalorder %s67_s27, %s67_s27 }
  0x3c   :  { %p1001_p13 = scmp.ne.s32.totalorder %s67_s27, %s1000_s14  ;;  %p1006_p1 = scmp.lt.s32.totalorder %s1000_s14, %s1000_s14 }
  0x3e   :  { %p1007_p2 = por %p1006_p1, %p1005_p0 }
  0x40   :  { %p1008_p3 = pnand %p1007_p2, %p1001_p13 }
  0x42   :  { %1011 = shalt.err (!%p1008_p3)
}
  0x43   :  { %72 = dma.hbm_to_vmem [thread:$0]  %s1165_s7, 1024, %s67_s27, [#allocation8], %s1023_s1, %s1023_s1, %s1024_s12  }
  0x44   :  { %1012 = dma.done.wait [#allocation3], 512  }
  0x45   :  { %1013 = vsyncadd [#allocation3], 4294966784 }
  0x46   :  { %1014 = dma.done.wait [#allocation5], 6144  }
  0x47   :  { %1015 = vsyncadd [#allocation5], 4294961152 }
  0x48   :  { %1016 = dma.done.wait [#allocation8], 1024  }
  0x49   :  { %1017 = vsyncadd [#allocation8], 4294966272  ;;  %v1026_v0 = vmov 0   ;;  %v846_v1 = vld [vmem:[#allocation2 + $0x4] ss:$8 sps:$4 sm:$0xff]   ;;  %vm126_vm0 = vcmask 261120   ;;  %v96_v51 = vlaneseq }
  0x4a   :  { %162 = vmatprep.mubr.bf16.mxu0 %v1026_v0  ;;  %v848_v2 = vld [vmem:[#allocation2] ss:$8 sps:$4 sm:$0xff]   ;;  %130 = vmatprep.subr.bf16.mxu0 %v846_v1  ;;  %v849_v3 = vld [vmem:[#allocation2 + $0x14] ss:$8 sps:$4 sm:$0xff]   ;;  %v851_v4 = vld [vmem:[#allocation2 + $0x10] ss:$8 sps:$4 sm:$0xff]  }
  0x4b   :  { %v88_v5 = vld [vmem:[%s1158_s0] sm:$0xff]  ;;  %131 = vmatpush1.bf16.msra.mxu0 %v848_v2  ;;  %v855_v8 = vld [vmem:[#allocation4 + $0x14] ss:$8 sps:$4 sm:$0xff]   ;;  %v857_v10 = vld [vmem:[#allocation4 + $0x10] ss:$8 sps:$4 sm:$0xff]   ;;  %v97_v52 = vshrl.u32 %v96_v51, 7 }
  0x4c   :  { %v852_v6 = vld [vmem:[#allocation4 + $0x4] ss:$8 sps:$4 sm:$0xff]   ;;  %132 = vmatprep.subr.bf16.mxu0 %v849_v3  ;;  %v854_v7 = vld [vmem:[#allocation4] ss:$8 sps:$4 sm:$0xff]   ;;  %v89_v9 = vpack.c.bf16 %v88_v5, %v88_v5  ;;  %v861_v13 = vld [vmem:[#allocation4 + $0x34] ss:$8 sps:$4 sm:$0xff]  }
  0x4d   :  { %379 = vmatprep.subr.bf16.mxu1 %v852_v6  ;;  %v858_v11 = vld [vmem:[#allocation4 + $0x24] ss:$8 sps:$4 sm:$0xff]   ;;  %v860_v12 = vld [vmem:[#allocation4 + $0x20] ss:$8 sps:$4 sm:$0xff]   ;;  %v863_v14 = vld [vmem:[#allocation4 + $0x30] ss:$8 sps:$4 sm:$0xff]  }
  0x4e   :  { %380 = vmatpush1.bf16.msra.mxu1 %v854_v7  ;;  %v864_v15 = vld [vmem:[#allocation4 + $0x44] ss:$8 sps:$4 sm:$0xff]   ;;  %v866_v16 = vld [vmem:[#allocation4 + $0x40] ss:$8 sps:$4 sm:$0xff]   ;;  %v867_v17 = vld [vmem:[#allocation4 + $0x54] ss:$8 sps:$4 sm:$0xff]  }
  0x4f   :  { %133 = vmatpush1.bf16.msra.mxu0 %v851_v4  ;;  %381 = vmatprep.subr.bf16.mxu1 %v855_v8  ;;  %v869_v18 = vld [vmem:[#allocation4 + $0x50] ss:$8 sps:$4 sm:$0xff]   ;;  %v870_v19 = vld [vmem:[#allocation4 + $0x64] ss:$8 sps:$4 sm:$0xff]   ;;  %v872_v20 = vld [vmem:[#allocation4 + $0x60] ss:$8 sps:$4 sm:$0xff]  }
  0x50   :  { %v873_v21 = vld [vmem:[#allocation4 + $0x74] ss:$8 sps:$4 sm:$0xff]   ;;  %v875_v22 = vld [vmem:[#allocation4 + $0x70] ss:$8 sps:$4 sm:$0xff]   ;;  %v876_v23 = vld [vmem:[#allocation4 + $0x84] ss:$8 sps:$4 sm:$0xff]  }
  0x51   :  { %v878_v24 = vld [vmem:[#allocation4 + $0x80] ss:$8 sps:$4 sm:$0xff]   ;;  %v879_v25 = vld [vmem:[#allocation4 + $0x94] ss:$8 sps:$4 sm:$0xff]   ;;  %v881_v26 = vld [vmem:[#allocation4 + $0x90] ss:$8 sps:$4 sm:$0xff]  }
  0x52   :  { %725 = vmatmul.mubr.msk.bf16.vlgmr.msra.gmra.mrb[0].mxu0 %vm126_vm0, %v89_v9  ;;  %382 = vmatpush1.bf16.msra.mxu1 %v857_v10  ;;  %v882_v27 = vld [vmem:[#allocation4 + $0xa4] ss:$8 sps:$4 sm:$0xff]   ;;  %v884_v28 = vld [vmem:[#allocation4 + $0xa0] ss:$8 sps:$4 sm:$0xff]   ;;  %v885_v29 = vld [vmem:[#allocation4 + $0xb4] ss:$8 sps:$4 sm:$0xff]  }
  0x53   :  { %383 = vmatprep.subr.bf16.mxu1 %v858_v11  ;;  %v887_v30 = vld [vmem:[#allocation4 + $0xb0] ss:$8 sps:$4 sm:$0xff]   ;;  %v888_v31 = vld [vmem:[#allocation4 + $0xc4] ss:$8 sps:$4 sm:$0xff]   ;;  %v890_v32 = vld [vmem:[#allocation4 + $0xc0] ss:$8 sps:$4 sm:$0xff]  }
  0x54   :  { %v891_v33 = vld [vmem:[#allocation4 + $0xd4] ss:$8 sps:$4 sm:$0xff]   ;;  %v893_v34 = vld [vmem:[#allocation4 + $0xd0] ss:$8 sps:$4 sm:$0xff]   ;;  %v894_v35 = vld [vmem:[#allocation4 + $0xe4] ss:$8 sps:$4 sm:$0xff]  }
  0x55   :  { %v896_v36 = vld [vmem:[#allocation4 + $0xe0] ss:$8 sps:$4 sm:$0xff]   ;;  %v897_v37 = vld [vmem:[#allocation4 + $0xf4] ss:$8 sps:$4 sm:$0xff]   ;;  %v899_v38 = vld [vmem:[#allocation4 + $0xf0] ss:$8 sps:$4 sm:$0xff]  }
  0x56   :  { %384 = vmatpush1.bf16.msra.mxu1 %v860_v12  ;;  %v900_v39 = vld [vmem:[#allocation6 + $0x40] sm:$0xff]   ;;  %v902_v41 = vld [vmem:[#allocation6 + $0x48] sm:$0xff]   ;;  %v904_v43 = vld [vmem:[#allocation6 + $0x50] sm:$0xff]   ;;  %v98_v53 = vsub.s32 0, %v97_v52  ;;  %v102_v55 = vsub.s32 1, %v97_v52  ;;  %v1027_v9 = vmov 0.0  }
  0x57   :  { %385 = vmatprep.subr.bf16.mxu1 %v861_v13  ;;  %v901_v40 = vld [vmem:[#allocation6] sm:$0xff]   ;;  %784 = vmatprep.subr.bf16.mxu0 %v900_v39  ;;  %v903_v42 = vld [vmem:[#allocation6 + $0x8] sm:$0xff]   ;;  %v905_v44 = vld [vmem:[#allocation6 + $0x10] sm:$0xff]   ;;  %vm1028_vm1 = vmmov 0  }
  0x58   :  { %785 = vmatpush3.bf16.msra.mxu0 %v901_v40  ;;  %v906_v45 = vld [vmem:[#allocation6 + $0x58] sm:$0xff]   ;;  %v908_v47 = vld [vmem:[#allocation6 + $0x60] sm:$0xff]   ;;  %v910_v49 = vld [vmem:[#allocation6 + $0x68] sm:$0xff]  }
  0x59   :  { %786 = vmatprep.subr.bf16.mxu0 %v902_v41  ;;  %v907_v46 = vld [vmem:[#allocation6 + $0x18] sm:$0xff]   ;;  %v909_v48 = vld [vmem:[#allocation6 + $0x20] sm:$0xff]   ;;  %v911_v50 = vld [vmem:[#allocation6 + $0x28] sm:$0xff]  }
  0x5a   :  { %386 = vmatpush1.bf16.msra.mxu1 %v863_v14  ;;  %v94_v54 = vld [vmem:[%s1160_s2] sm:$0x3]  ;;  %v912_v5 = vld [vmem:[#allocation6 + $0x70] sm:$0xff]   ;;  %v914_v7 = vld [vmem:[#allocation6 + $0x78] sm:$0xff]  }
  0x5b   :  { %387 = vmatprep.subr.bf16.mxu1 %v864_v15  ;;  %v99_v56 = vrot.slane %v94_v54, %v98_v53  ;;  %v103_v57 = vrot.slane %v94_v54, %v102_v55  ;;  %v913_v6 = vld [vmem:[#allocation6 + $0x30] sm:$0xff]   ;;  %v915_v8 = vld [vmem:[#allocation6 + $0x38] sm:$0xff]   ;;  %v207_v10 = vld [vmem:[%s1162_s4] sm:$0x3] }
  0x5c   :  { %787 = vmatpush3.bf16.msra.mxu0 %v903_v42  ;;  %v212_v11 = vrot.slane %v207_v10, %v98_v53  ;;  %v216_v12 = vrot.slane %v207_v10, %v102_v55  ;;  %v775_v40 = vld [vmem:[%s1166_s8] ss:$0 sm:$0xff] }
  0x5d   :  { %788 = vmatprep.subr.bf16.mxu0 %v904_v43 }
  0x5e   :  { %388 = vmatpush1.bf16.msra.mxu1 %v866_v16 }
  0x5f   :  { %389 = vmatprep.subr.bf16.mxu1 %v867_v17 }
  0x60   :  { %789 = vmatpush3.bf16.msra.mxu0 %v905_v44 }
  0x61   :  { %790 = vmatprep.subr.bf16.mxu0 %v906_v45 }
  0x62   :  { %390 = vmatpush1.bf16.msra.mxu1 %v869_v18 }
  0x63   :  { %391 = vmatprep.subr.bf16.mxu1 %v870_v19 }
  0x64   :  { %791 = vmatpush3.bf16.msra.mxu0 %v907_v46 }
  0x65   :  { %792 = vmatprep.subr.bf16.mxu0 %v908_v47 }
  0x66   :  { %392 = vmatpush1.bf16.msra.mxu1 %v872_v20 }
  0x67   :  { %393 = vmatprep.subr.bf16.mxu1 %v873_v21 }
  0x68   :  { %793 = vmatpush3.bf16.msra.mxu0 %v909_v48 }
  0x69   :  { %794 = vmatprep.subr.bf16.mxu0 %v910_v49 }
  0x6a   :  { %394 = vmatpush1.bf16.msra.mxu1 %v875_v22  ;;  %v916_v22 = vld [vmem:[#allocation7] sm:$0xff]  }
  0x6b   :  { %395 = vmatprep.subr.bf16.mxu1 %v876_v23 }
  0x6c   :  { %795 = vmatpush3.bf16.msra.mxu0 %v911_v50 }
  0x6d   :  { %796 = vmatprep.subr.bf16.mxu0 %v912_v5 }
  0x6e   :  { %396 = vmatpush1.bf16.msra.mxu1 %v878_v24  ;;  %v917_v24 = vld [vmem:[#allocation7 + $0x8] sm:$0xff]  }
  0x6f   :  { %397 = vmatprep.subr.bf16.mxu1 %v879_v25  ;;  %v918_v25 = vld [vmem:[#allocation7 + $0x10] sm:$0xff]  }
  0x70   :  { %797 = vmatpush3.bf16.msra.mxu0 %v913_v6 }
  0x71   :  { %798 = vmatprep.subr.bf16.mxu0 %v914_v7 }
  0x72   :  { %398 = vmatpush1.bf16.msra.mxu1 %v881_v26  ;;  %v919_v26 = vld [vmem:[#allocation7 + $0x18] sm:$0xff]  }
  0x73   :  { %399 = vmatprep.subr.bf16.mxu1 %v882_v27  ;;  %v920_v27 = vld [vmem:[#allocation7 + $0x20] sm:$0xff]  }
  0x74   :  { %799 = vmatpush3.bf16.msra.mxu0 %v915_v8 }
  0x75   :  { %815 = vmatprep.subr.bf16.mxu0 %v1027_v9 }
  0x76   :  { %400 = vmatpush1.bf16.msra.mxu1 %v884_v28  ;;  %v921_v28 = vld [vmem:[#allocation7 + $0x28] sm:$0xff]  }
  0x77   :  { %401 = vmatprep.subr.bf16.mxu1 %v885_v29  ;;  %v922_v29 = vld [vmem:[#allocation7 + $0x30] sm:$0xff]  }
  0x7a   :  { %402 = vmatpush1.bf16.msra.mxu1 %v887_v30  ;;  %v923_v30 = vld [vmem:[#allocation7 + $0x38] sm:$0xff]  }
  0x7b   :  { %403 = vmatprep.subr.bf16.mxu1 %v888_v31 }
  0x7e   :  { %404 = vmatpush1.bf16.msra.mxu1 %v890_v32  ;;  %v758_v32 = vld [vmem:[%s1164_s6] ss:$0 sm:$0xff] }
  0x7f   :  { %405 = vmatprep.subr.bf16.mxu1 %v891_v33 }
  0x82   :  { %406 = vmatpush1.bf16.msra.mxu1 %v893_v34 }
  0x83   :  { %407 = vmatprep.subr.bf16.mxu1 %v894_v35 }
  0x86   :  { %408 = vmatpush1.bf16.msra.mxu1 %v896_v36 }
  0x87   :  { %409 = vmatprep.subr.bf16.mxu1 %v897_v37 }
  0x8a   :  { %410 = vmatpush1.bf16.msra.mxu1 %v899_v38 }
 0x125   :  { %v164_v58 = vpop.f32.mrb[0].mxu0 }
 0x126   :  { %v165_v59 = vadd.f32 %v164_v58, %v99_v56  ;;  %v166_v60 = vpop.f32.mrb[1].mxu0 }
 0x127   :  { %v167_v61 = vadd.f32 %v166_v60, %v103_v57  ;;  %v168_v62 = vpop.f32.mrb[2].mxu0 }
 0x128   :  { %v171_v63 = vpack.c.bf16 %v165_v59, %v165_v59  ;;  %v169_v1 = vpop.f32.mrb[3].mxu0 }
 0x129   :  { %v172_v2 = vpack.c.bf16 %v167_v61, %v167_v61 }
 0x12a   :  { %v173_v4 = vmax.bf16 %v1026_v0, %v171_v63 }
 0x12b   :  { %v174_v3 = vmax.bf16 %v1026_v0, %v172_v2 }
 0x12d   :  { %411 = vmatprep.mubr.bf16.mxu1 %v174_v3 }
 0x12e   :  { %412 = vmatmul.mubr.bf16.vlgmr.msra.gmra.mrb[0].mxu1 %v173_v4 }
 0x201   :  { %v413_v13 = vpop.f32.mrb[0].mxu1 }
 0x202   :  { %v414_v14 = vadd.f32 %v413_v13, %v212_v11  ;;  %v415_v15 = vpop.f32.mrb[1].mxu1 }
 0x203   :  { %v416_v16 = vadd.f32 %v415_v15, %v216_v12  ;;  %v417_v17 = vpop.f32.mrb[2].mxu1 }
 0x204   :  { %v420_v18 = vpack.c.bf16 %v414_v14, %v414_v14  ;;  %v418_v19 = vpop.f32.mrb[3].mxu1 }
 0x205   :  { %v421_v20 = vpack.c.bf16 %v416_v16, %v416_v16 }
 0x206   :  { %v422_v23 = vmax.bf16 %v1026_v0, %v420_v18 }
 0x207   :  { %v423_v21 = vmax.bf16 %v1026_v0, %v421_v20 }
 0x209   :  { %591 = vmatprep.mubr.bf16.mxu0 %v423_v21 }
 0x20a   :  { %592 = vmatmul.mubr.bf16.vlgmr.msra.gmra.mrb[4].mxu0 %v422_v23 }
 0x20b   :  { %816 = vmatpush3.bf16.msra.mxu0 %v916_v22  ;;  %831 = vmatprep.mubr.msk.bf16.mxu0 %vm1028_vm1, %v1027_v9 }
 0x20c   :  { %817 = vmatprep.subr.bf16.mxu0 %v1027_v9 }
 0x20f   :  { %818 = vmatpush3.bf16.msra.mxu0 %v917_v24 }
 0x210   :  { %819 = vmatprep.subr.bf16.mxu0 %v1027_v9 }
 0x213   :  { %820 = vmatpush3.bf16.msra.mxu0 %v918_v25 }
 0x214   :  { %821 = vmatprep.subr.bf16.mxu0 %v1027_v9 }
 0x217   :  { %822 = vmatpush3.bf16.msra.mxu0 %v919_v26 }
 0x218   :  { %823 = vmatprep.subr.bf16.mxu0 %v1027_v9 }
 0x21b   :  { %824 = vmatpush3.bf16.msra.mxu0 %v920_v27 }
 0x21c   :  { %825 = vmatprep.subr.bf16.mxu0 %v1027_v9 }
 0x21f   :  { %826 = vmatpush3.bf16.msra.mxu0 %v921_v28 }
 0x220   :  { %827 = vmatprep.subr.bf16.mxu0 %v1027_v9 }
 0x223   :  { %828 = vmatpush3.bf16.msra.mxu0 %v922_v29 }
 0x224   :  { %829 = vmatprep.subr.bf16.mxu0 %v1027_v9 }
 0x227   :  { %830 = vmatpush3.bf16.msra.mxu0 %v923_v30 }
 0x2dd   :  { %v800_v31 = vpop.f32.mrb[4].mxu0 }
 0x2de   :  { %v801_v33 = vpop.f32.mrb[5].mxu0 }
 0x2df   :  { %v802_v34 = vadd.f32 %v801_v33, %v800_v31  ;;  %v803_v35 = vpop.f32.mrb[6].mxu0 }
 0x2e0   :  { %v804_v36 = vpop.f32.mrb[7].mxu0 }
 0x2e1   :  { %v594_v37 = vadd.f32 %v802_v34, %v758_v32 }
 0x2e3   :  { %v599_v38 = vpack.c.bf16 %v594_v37, %v594_v37 }
 0x2e5   :  { %v600_v39 = vmax.bf16 %v1026_v0, %v599_v38 }
 0x2e7   :  { %832 = vmatmul.mubr.bf16.vlgmr.msra.gmra.mrb[8].mxu0 %v600_v39 }
 0x3ba   :  { %v706_v41 = vpop.f32.mrb[8].mxu0 }
 0x3bb   :  { %v707_v42 = vadd.f32 %v775_v40, %v706_v41  ;;  %v833_v43 = vpop.f32.mrb[9].mxu0 }
 0x3bc   :  { %v709_v44 = vpop.f32.mrb[10].mxu0 }
 0x3bd   :  { %v712_v45 = vpack.c.bf16 %v707_v42, %v707_v42  ;;  %v834_v46 = vpop.f32.mrb[11].mxu0 }
 0x3bf   :  { %713 = vst [vmem:[%s1167_s9] sm:$0xf] %v712_v45 }
 0x3c0   :  { %718 = vsyncpa [#allocation3], 1 }
 0x3c1   :  { %719 = vsyncpa [#allocation5], 1 }
 0x3c2   :  { %720 = vsyncpa [#allocation8], 1 }

</bundles_post_ra>
